<compile_context>
chip_gen: v7x
topology: tpu7x:2x2x1
jax: 0.10.0
libtpu: 0.0.40
codegen_flags: <defaults>
</compile_context>

<pallas_src>
import jax
import jax.numpy as jnp
from jax.experimental import pallas as pl
from jax.experimental.pallas import tpu as pltpu


def _bcast_mul_kernel(scale_ref, x_ref, o_ref):
    # scale_ref: (tile_r, 1), x_ref: (tile_r, tile_hw) -> lane-broadcast VPU multiply.
    o_ref[...] = (x_ref[...] * scale_ref[...]).astype(o_ref.dtype)


def _min_sublane(dtype) -> int:
    # Minimum sublane tile: 8 for 4-byte dtypes, 16 for 2-byte, 32 for 1-byte.
    return max(8, 32 // jnp.dtype(dtype).itemsize)


def broadcast_mul(x56, x51, *, target_block_bytes=2 * 1024 * 1024):
    """Computes x56 * x51 with x56 of shape (N, C, 1, 1) and x51 of shape (N, C, H, W)."""
    N, C, H, W = x51.shape
    assert x56.shape == (N, C, 1, 1)
    rows, hw = N * C, H * W
    out_dtype = jnp.result_type(x56.dtype, x51.dtype)

    scale = x56.reshape(rows, 1)
    x = x51.reshape(rows, hw)

    in_b = jnp.dtype(x.dtype).itemsize
    out_b = jnp.dtype(out_dtype).itemsize
    sc_b = jnp.dtype(scale.dtype).itemsize
    elem_b = max(in_b, out_b)

    min_r = max(_min_sublane(x.dtype), _min_sublane(out_dtype))
    eff_min_r = min(min_r, rows)

    # --- byte-budget block sizing ------------------------------------------
    # Prefer full-HW (contiguous) row slabs; only tile the lane axis if even a
    # minimum-row slab exceeds the block budget.
    if eff_min_r * hw * elem_b <= target_block_bytes or hw <= 128:
        tile_hw = hw                                     # full lane extent -> contiguous DMA
    else:
        lanes = (target_block_bytes // (eff_min_r * elem_b)) // 128 * 128
        tile_hw = min(hw, max(128, lanes))               # multiple of 128 -> unmasked vst

    if rows <= min_r:
        tile_r = rows                                    # full-dim block (exempt from the 8 rule)
    else:
        max_r = (target_block_bytes // (tile_hw * elem_b)) // min_r * min_r
        tile_r = min(rows, max(min_r, max_r))            # multiple of min_r (partial tail is masked)

    grid = (pl.cdiv(rows, tile_r), pl.cdiv(hw, tile_hw))

    # 2x double-buffered input + output blocks + lane-padded scale block, with headroom.
    block_bytes = tile_r * tile_hw * (in_b + out_b) + tile_r * 128 * sc_b
    vmem_limit = int(min(96 * 1024 * 1024, max(32 * 1024 * 1024, 4 * block_bytes)))

    cost = pl.CostEstimate(
        flops=rows * hw,
        transcendentals=0,
        bytes_accessed=rows * hw * (in_b + out_b) + rows * sc_b,
    )

    out = pl.pallas_call(
        _bcast_mul_kernel,
        out_shape=jax.ShapeDtypeStruct((rows, hw), out_dtype),
        grid=grid,
        in_specs=[
            # Per-step scale slice: a few KB of VMEM instead of a resident (rows, 1) block.
            pl.BlockSpec((tile_r, 1), lambda i, j: (i, 0)),
            pl.BlockSpec((tile_r, tile_hw), lambda i, j: (i, j)),
        ],
        out_specs=pl.BlockSpec((tile_r, tile_hw), lambda i, j: (i, j)),
        compiler_params=pltpu.CompilerParams(
            dimension_semantics=("parallel", "parallel"),
            vmem_limit_bytes=vmem_limit,
        ),
        cost_estimate=cost,
    )(scale, x)
    return out.reshape(N, C, H, W)


if __name__ == "__main__":
    key = jax.random.PRNGKey(0)
    k1, k2, k3, k4, k5, k6, k7, k8 = jax.random.split(key, 8)

    def _check(scale, x, **kw):
        out = broadcast_mul(scale, x, **kw)
        jax.block_until_ready(out)
        ref = scale * x
        assert out.shape == ref.shape
        assert out.dtype == jnp.result_type(scale.dtype, x.dtype)
        assert jnp.allclose(out, ref, atol=1e-6, rtol=1e-6)

    # 1) Canonical module shapes: x56=(1,240,1,1), x51=(1,240,14,14).
    _check(jax.random.normal(k1, (1, 240, 1, 1), dtype=jnp.float32),
           jax.random.normal(k2, (1, 240, 14, 14), dtype=jnp.float32))

    # 2) Small batched case (batch folded into the row/sublane axis).
    _check(jax.random.normal(k3, (2, 16, 1, 1), dtype=jnp.float32),
           jax.random.normal(k4, (2, 16, 14, 14), dtype=jnp.float32))

    # 3) Exercise the row-tiling path (grid=(7,1), masked partial final row block).
    _check(jax.random.normal(k5, (1, 100, 1, 1), dtype=jnp.float32),
           jax.random.normal(k6, (1, 100, 32, 32), dtype=jnp.float32),
           target_block_bytes=64 * 1024)

    # 4) Exercise the lane-tiling fallback path (grid=(1,2), 128-multiple lane tile).
    _check(jax.random.normal(k7, (1, 4, 1, 1), dtype=jnp.float32),
           jax.random.normal(k8, (1, 4, 64, 64), dtype=jnp.float32),
           target_block_bytes=32 * 1024)

    print("KERNEL_OK")
</pallas_src>

<mosaic_0001>
module attributes {stable_mosaic.version = 11 : i64} {
  func.func @_bcast_mul_kernel(%arg0: i32, %arg1: i32, %arg2: memref<240x1xf32, #tpu.memory_space<vmem>>, %arg3: memref<240x196xf32, #tpu.memory_space<vmem>>, %arg4: memref<240x196xf32, #tpu.memory_space<vmem>>) attributes {dimension_semantics = [#tpu.dimension_semantics<parallel>, #tpu.dimension_semantics<parallel>], iteration_bounds = array<i64: 1, 1>, scalar_prefetch = 0 : i64, scratch_operands = 0 : i64, tpu.core_type = #tpu.core_type<tc>, window_params = [{transform_indices = @transform_0, window_bounds = array<i64: 240, 1>}, {transform_indices = @transform_1, window_bounds = array<i64: 240, 196>}, {transform_indices = @transform_2, window_bounds = array<i64: 240, 196>}]} {
    %c0 = arith.constant 0 : index
    %c0_0 = arith.constant 0 : index
    %0 = vector.load %arg3[%c0, %c0_0] : memref<240x196xf32, #tpu.memory_space<vmem>>, vector<240x196xf32>
    %c0_1 = arith.constant 0 : index
    %c0_2 = arith.constant 0 : index
    %1 = vector.load %arg2[%c0_1, %c0_2] : memref<240x1xf32, #tpu.memory_space<vmem>>, vector<240x1xf32>
    %2 = vector.broadcast %1 : vector<240x1xf32> to vector<240x196xf32>
    %3 = arith.mulf %0, %2 : vector<240x196xf32>
    %c0_3 = arith.constant 0 : index
    %c0_4 = arith.constant 0 : index
    %4 = vector.load %arg4[%c0_3, %c0_4] : memref<240x196xf32, #tpu.memory_space<vmem>>, vector<240x196xf32>
    tpu.vector_store %arg4[%c0_3, %c0_4], %3 {strides = array<i32>} : memref<240x196xf32, #tpu.memory_space<vmem>>, vector<240x196xf32>,
    return
  }
  func.func @transform_0(%arg0: i32, %arg1: i32) -> (i32, i32) {
    %c0_i32 = arith.constant 0 : i32
    %c0_i32_0 = arith.constant 0 : i32
    return %arg0, %c0_i32 : i32, i32
  }
  func.func @transform_1(%arg0: i32, %arg1: i32) -> (i32, i32) {
    %c0_i32 = arith.constant 0 : i32
    return %arg0, %arg1 : i32, i32
  }
  func.func @transform_2(%arg0: i32, %arg1: i32) -> (i32, i32) {
    %c0_i32 = arith.constant 0 : i32
    return %arg0, %arg1 : i32, i32
  }
}

</mosaic_0001>

<bundles_post_ra>
// kernel: tpu_custom_call.1
= control target key start
LH: loop header
LB: loop body
LE: loop exit
PB: predicated region body
PF: predicated region fallthrough
CT: control target
= control target key end

     0   :  { %v379_v0 = vmov 0   ;;  %vm312_vm0 = vcmask 556032   ;;  %s875_s0 = inlined_call_operand.vmem [shape: f32[240,1], index: 0, kind: input, shape index: {}]   ;;  %s876_s1 = inlined_call_operand.vmem [shape: f32[240,196], index: 1, kind: input, shape index: {}]   ;;  %s877_s2 = inlined_call_operand.vmem [shape: f32[240,196], index: 2, kind: output, shape index: {}]  }
   0x1   :  { %378 = vset.pattern.permute.xlu1 %v379_v0  ;;  %377 = vset.pattern.permute.xlu0 %v379_v0  ;;  %v73_v1 = vld [vmem:[%s875_s0 + $0x10] sm:$0xff]  ;;  %v71_v2 = vld [vmem:[%s875_s0] sm:$0xff]  ;;  %v74_v3 = vld [vmem:[%s875_s0 + $0x18] sm:$0xff] }
   0x2   :  { %113 = vperm.xlu1 %378, %v73_v1   ;;  %103 = vperm.xlu0 %377, %v71_v2   ;;  %v72_v4 = vld [vmem:[%s875_s0 + $0x8] sm:$0xff]  ;;  %v75_v6 = vld [vmem:[%s875_s0 + $0x20] sm:$0xff]  ;;  %v78_v7 = vld [vmem:[%s875_s0 + $0x38] sm:$0xff] }
   0x3   :  { %v76_v5 = vld [vmem:[%s875_s0 + $0x28] sm:$0xff]  ;;  %v77_v8 = vld [vmem:[%s875_s0 + $0x30] sm:$0xff]  ;;  %v79_v10 = vld [vmem:[%s875_s0 + $0x40] sm:$0xff] }
   0x4   :  { %v80_v9 = vld [vmem:[%s875_s0 + $0x48] sm:$0xff]  ;;  %v82_v11 = vld [vmem:[%s875_s0 + $0x58] sm:$0xff]  ;;  %v81_v12 = vld [vmem:[%s875_s0 + $0x50] sm:$0xff] }
   0x5   :  { %v84_v13 = vld [vmem:[%s875_s0 + $0x68] sm:$0xff]  ;;  %v83_v14 = vld [vmem:[%s875_s0 + $0x60] sm:$0xff]  ;;  %v86_v15 = vld [vmem:[%s875_s0 + $0x78] sm:$0xff] }
   0x6   :  { %118 = vperm.xlu1 %378, %v74_v3   ;;  %108 = vperm.xlu0 %377, %v72_v4   ;;  %v85_v16 = vld [vmem:[%s875_s0 + $0x70] sm:$0xff]  ;;  %v88_v17 = vld [vmem:[%s875_s0 + $0x88] sm:$0xff]  ;;  %v87_v18 = vld [vmem:[%s875_s0 + $0x80] sm:$0xff] }
   0x7   :  { %v90_v19 = vld [vmem:[%s875_s0 + $0x98] sm:$0xff]  ;;  %v89_v20 = vld [vmem:[%s875_s0 + $0x90] sm:$0xff]  ;;  %v92_v21 = vld [vmem:[%s875_s0 + $0xa8] sm:$0xff] }
   0x8   :  { %v91_v22 = vld [vmem:[%s875_s0 + $0xa0] sm:$0xff]  ;;  %v94_v23 = vld [vmem:[%s875_s0 + $0xb8] sm:$0xff]  ;;  %v93_v24 = vld [vmem:[%s875_s0 + $0xb0] sm:$0xff] }
   0x9   :  { %v96_v25 = vld [vmem:[%s875_s0 + $0xc8] sm:$0xff]  ;;  %v95_v26 = vld [vmem:[%s875_s0 + $0xc0] sm:$0xff]  ;;  %v98_v27 = vld [vmem:[%s875_s0 + $0xd8] sm:$0xff] }
   0xa   :  { %128 = vperm.xlu1 %378, %v76_v5   ;;  %123 = vperm.xlu0 %377, %v75_v6   ;;  %v97_v28 = vld [vmem:[%s875_s0 + $0xd0] sm:$0xff]  ;;  %v100_v29 = vld [vmem:[%s875_s0 + $0xe8] sm:$0xff]  ;;  %v99_v30 = vld [vmem:[%s875_s0 + $0xe0] sm:$0xff] }
   0xb   :  { %v15_v31 = vld [vmem:[%s876_s1 + $0x20] sm:$0xff]  ;;  %v16_v32 = vld [vmem:[%s876_s1 + $0x28] sm:$0xff]  ;;  %v17_v41 = vld [vmem:[%s876_s1 + $0x30] sm:$0xff] }
   0xc   :  { %v11_v33 = vld [vmem:[%s876_s1] sm:$0xff]  ;;  %v12_v34 = vld [vmem:[%s876_s1 + $0x8] sm:$0xff]  ;;  %v18_v42 = vld [vmem:[%s876_s1 + $0x38] sm:$0xff] }
   0xd   :  { %v13_v43 = vld [vmem:[%s876_s1 + $0x10] sm:$0xff]  ;;  %v14_v44 = vld [vmem:[%s876_s1 + $0x18] sm:$0xff]  ;;  %v19_v53 = vld [vmem:[%s876_s1 + $0x40] sm:$0xff] }
   0xe   :  { %138 = vperm.xlu1 %378, %v78_v7   ;;  %133 = vperm.xlu0 %377, %v77_v8   ;;  %v21_v51 = vld [vmem:[%s876_s1 + $0x50] sm:$0xff]  ;;  %v22_v52 = vld [vmem:[%s876_s1 + $0x58] sm:$0xff]  ;;  %v20_v54 = vld [vmem:[%s876_s1 + $0x48] sm:$0xff] }
   0xf   :  { %v25_v61 = vld [vmem:[%s876_s1 + $0x70] sm:$0xff]  ;;  %v26_v62 = vld [vmem:[%s876_s1 + $0x78] sm:$0xff]  ;;  %v23_v63 = vld [vmem:[%s876_s1 + $0x60] sm:$0xff] }
  0x10   :  { %v24_v0 = vld [vmem:[%s876_s1 + $0x68] sm:$0xff]  ;;  %v29_v7 = vld [vmem:[%s876_s1 + $0x90] sm:$0xff]  ;;  %v30_v8 = vld [vmem:[%s876_s1 + $0x98] sm:$0xff] }
  0x12   :  { %148 = vperm.xlu1 %378, %v80_v9   ;;  %143 = vperm.xlu0 %377, %v79_v10   ;;  %v27_v9 = vld [vmem:[%s876_s1 + $0x80] sm:$0xff]  ;;  %v28_v10 = vld [vmem:[%s876_s1 + $0x88] sm:$0xff] }
  0x16   :  { %158 = vperm.xlu1 %378, %v82_v11   ;;  %153 = vperm.xlu0 %377, %v81_v12  }
  0x1a   :  { %168 = vperm.xlu1 %378, %v84_v13   ;;  %163 = vperm.xlu0 %377, %v83_v14  }
  0x1e   :  { %178 = vperm.xlu1 %378, %v86_v15   ;;  %173 = vperm.xlu0 %377, %v85_v16  }
  0x22   :  { %188 = vperm.xlu1 %378, %v88_v17   ;;  %183 = vperm.xlu0 %377, %v87_v18   ;;  %v33_v17 = vld [vmem:[%s876_s1 + $0xb0] sm:$0xff]  ;;  %v34_v18 = vld [vmem:[%s876_s1 + $0xb8] sm:$0xff] }
  0x26   :  { %198 = vperm.xlu1 %378, %v90_v19   ;;  %193 = vperm.xlu0 %377, %v89_v20   ;;  %v31_v19 = vld [vmem:[%s876_s1 + $0xa0] sm:$0xff]  ;;  %v32_v20 = vld [vmem:[%s876_s1 + $0xa8] sm:$0xff] }
  0x2a   :  { %208 = vperm.xlu1 %378, %v92_v21   ;;  %203 = vperm.xlu0 %377, %v91_v22  }
  0x2e   :  { %218 = vperm.xlu1 %378, %v94_v23   ;;  %213 = vperm.xlu0 %377, %v93_v24  }
  0x32   :  { %228 = vperm.xlu1 %378, %v96_v25   ;;  %223 = vperm.xlu0 %377, %v95_v26  }
  0x36   :  { %238 = vperm.xlu1 %378, %v98_v27   ;;  %233 = vperm.xlu0 %377, %v97_v28   ;;  %v37_v27 = vld [vmem:[%s876_s1 + $0xd0] sm:$0xff]  ;;  %v38_v28 = vld [vmem:[%s876_s1 + $0xd8] sm:$0xff] }
  0x3a   :  { %248 = vperm.xlu1 %378, %v100_v29   ;;  %243 = vperm.xlu0 %377, %v99_v30   ;;  %v35_v29 = vld [vmem:[%s876_s1 + $0xc0] sm:$0xff]  ;;  %v36_v30 = vld [vmem:[%s876_s1 + $0xc8] sm:$0xff] }
  0x81   :  { %v114_v35 = vpop.permute.xlu1 %113  ;;  %v104_v36 = vpop.permute.xlu0 %103 }
  0x82   :  { %v255_v37 = vmul.f32 %v114_v35, %v15_v31  ;;  %v256_v38 = vmul.f32 %v114_v35, %v16_v32  ;;  %v251_v39 = vmul.f32 %v104_v36, %v11_v33  ;;  %v252_v40 = vmul.f32 %v104_v36, %v12_v34 }
  0x84   :  { %316 = vst [vmem:[%s877_s2 + $0x20] sm:$0xff] %v255_v37  ;;  %317 = vst.msk [vmem:[%s877_s2 + $0x28] sm:$0xff] %vm312_vm0, %v256_v38  ;;  %v41_v37 = vld [vmem:[%s876_s1 + $0xf0] sm:$0xff]  ;;  %v42_v38 = vld [vmem:[%s876_s1 + $0xf8] sm:$0xff] }
  0x85   :  { %311 = vst [vmem:[%s877_s2] sm:$0xff] %v251_v39  ;;  %313 = vst.msk [vmem:[%s877_s2 + $0x8] sm:$0xff] %vm312_vm0, %v252_v40  ;;  %v119_v45 = vpop.permute.xlu1 %118  ;;  %v109_v46 = vpop.permute.xlu0 %108  ;;  %v39_v39 = vld [vmem:[%s876_s1 + $0xe0] sm:$0xff]  ;;  %v40_v40 = vld [vmem:[%s876_s1 + $0xe8] sm:$0xff] }
  0x86   :  { %v257_v47 = vmul.f32 %v119_v45, %v17_v41  ;;  %v258_v48 = vmul.f32 %v119_v45, %v18_v42  ;;  %v253_v49 = vmul.f32 %v109_v46, %v13_v43  ;;  %v254_v50 = vmul.f32 %v109_v46, %v14_v44 }
  0x88   :  { %318 = vst [vmem:[%s877_s2 + $0x30] sm:$0xff] %v257_v47  ;;  %319 = vst.msk [vmem:[%s877_s2 + $0x38] sm:$0xff] %vm312_vm0, %v258_v48  ;;  %v45_v47 = vld [vmem:[%s876_s1 + $0x110] sm:$0xff]  ;;  %v46_v48 = vld [vmem:[%s876_s1 + $0x118] sm:$0xff] }
  0x89   :  { %314 = vst [vmem:[%s877_s2 + $0x10] sm:$0xff] %v253_v49  ;;  %315 = vst.msk [vmem:[%s877_s2 + $0x18] sm:$0xff] %vm312_vm0, %v254_v50  ;;  %v129_v55 = vpop.permute.xlu1 %128  ;;  %v124_v56 = vpop.permute.xlu0 %123  ;;  %v43_v49 = vld [vmem:[%s876_s1 + $0x100] sm:$0xff]  ;;  %v44_v50 = vld [vmem:[%s876_s1 + $0x108] sm:$0xff] }
  0x8a   :  { %v261_v57 = vmul.f32 %v129_v55, %v21_v51  ;;  %v262_v58 = vmul.f32 %v129_v55, %v22_v52  ;;  %v259_v59 = vmul.f32 %v124_v56, %v19_v53  ;;  %v260_v60 = vmul.f32 %v124_v56, %v20_v54 }
  0x8c   :  { %322 = vst [vmem:[%s877_s2 + $0x50] sm:$0xff] %v261_v57  ;;  %323 = vst.msk [vmem:[%s877_s2 + $0x58] sm:$0xff] %vm312_vm0, %v262_v58  ;;  %v49_v57 = vld [vmem:[%s876_s1 + $0x130] sm:$0xff]  ;;  %v50_v58 = vld [vmem:[%s876_s1 + $0x138] sm:$0xff] }
  0x8d   :  { %320 = vst [vmem:[%s877_s2 + $0x40] sm:$0xff] %v259_v59  ;;  %321 = vst.msk [vmem:[%s877_s2 + $0x48] sm:$0xff] %vm312_vm0, %v260_v60  ;;  %v139_v1 = vpop.permute.xlu1 %138  ;;  %v134_v2 = vpop.permute.xlu0 %133  ;;  %v47_v59 = vld [vmem:[%s876_s1 + $0x120] sm:$0xff]  ;;  %v48_v60 = vld [vmem:[%s876_s1 + $0x128] sm:$0xff] }
  0x8e   :  { %v265_v3 = vmul.f32 %v139_v1, %v25_v61  ;;  %v266_v4 = vmul.f32 %v139_v1, %v26_v62  ;;  %v263_v5 = vmul.f32 %v134_v2, %v23_v63  ;;  %v264_v6 = vmul.f32 %v134_v2, %v24_v0 }
  0x90   :  { %326 = vst [vmem:[%s877_s2 + $0x70] sm:$0xff] %v265_v3  ;;  %327 = vst.msk [vmem:[%s877_s2 + $0x78] sm:$0xff] %vm312_vm0, %v266_v4  ;;  %v53_v3 = vld [vmem:[%s876_s1 + $0x150] sm:$0xff]  ;;  %v54_v4 = vld [vmem:[%s876_s1 + $0x158] sm:$0xff] }
  0x91   :  { %324 = vst [vmem:[%s877_s2 + $0x60] sm:$0xff] %v263_v5  ;;  %325 = vst.msk [vmem:[%s877_s2 + $0x68] sm:$0xff] %vm312_vm0, %v264_v6  ;;  %v149_v11 = vpop.permute.xlu1 %148  ;;  %v144_v12 = vpop.permute.xlu0 %143  ;;  %v51_v5 = vld [vmem:[%s876_s1 + $0x140] sm:$0xff]  ;;  %v52_v6 = vld [vmem:[%s876_s1 + $0x148] sm:$0xff] }
  0x92   :  { %v269_v13 = vmul.f32 %v149_v11, %v29_v7  ;;  %v270_v14 = vmul.f32 %v149_v11, %v30_v8  ;;  %v267_v15 = vmul.f32 %v144_v12, %v27_v9  ;;  %v268_v16 = vmul.f32 %v144_v12, %v28_v10 }
  0x94   :  { %330 = vst [vmem:[%s877_s2 + $0x90] sm:$0xff] %v269_v13  ;;  %331 = vst.msk [vmem:[%s877_s2 + $0x98] sm:$0xff] %vm312_vm0, %v270_v14  ;;  %v57_v13 = vld [vmem:[%s876_s1 + $0x170] sm:$0xff]  ;;  %v58_v14 = vld [vmem:[%s876_s1 + $0x178] sm:$0xff] }
  0x95   :  { %328 = vst [vmem:[%s877_s2 + $0x80] sm:$0xff] %v267_v15  ;;  %329 = vst.msk [vmem:[%s877_s2 + $0x88] sm:$0xff] %vm312_vm0, %v268_v16  ;;  %v159_v21 = vpop.permute.xlu1 %158  ;;  %v154_v22 = vpop.permute.xlu0 %153  ;;  %v55_v15 = vld [vmem:[%s876_s1 + $0x160] sm:$0xff]  ;;  %v56_v16 = vld [vmem:[%s876_s1 + $0x168] sm:$0xff] }
  0x96   :  { %v273_v23 = vmul.f32 %v159_v21, %v33_v17  ;;  %v274_v24 = vmul.f32 %v159_v21, %v34_v18  ;;  %v271_v25 = vmul.f32 %v154_v22, %v31_v19  ;;  %v272_v26 = vmul.f32 %v154_v22, %v32_v20 }
  0x98   :  { %334 = vst [vmem:[%s877_s2 + $0xb0] sm:$0xff] %v273_v23  ;;  %335 = vst.msk [vmem:[%s877_s2 + $0xb8] sm:$0xff] %vm312_vm0, %v274_v24  ;;  %v61_v23 = vld [vmem:[%s876_s1 + $0x190] sm:$0xff]  ;;  %v62_v24 = vld [vmem:[%s876_s1 + $0x198] sm:$0xff] }
  0x99   :  { %332 = vst [vmem:[%s877_s2 + $0xa0] sm:$0xff] %v271_v25  ;;  %333 = vst.msk [vmem:[%s877_s2 + $0xa8] sm:$0xff] %vm312_vm0, %v272_v26  ;;  %v169_v31 = vpop.permute.xlu1 %168  ;;  %v164_v32 = vpop.permute.xlu0 %163  ;;  %v59_v25 = vld [vmem:[%s876_s1 + $0x180] sm:$0xff]  ;;  %v60_v26 = vld [vmem:[%s876_s1 + $0x188] sm:$0xff] }
  0x9a   :  { %v277_v33 = vmul.f32 %v169_v31, %v37_v27  ;;  %v278_v34 = vmul.f32 %v169_v31, %v38_v28  ;;  %v275_v35 = vmul.f32 %v164_v32, %v35_v29  ;;  %v276_v36 = vmul.f32 %v164_v32, %v36_v30 }
  0x9c   :  { %338 = vst [vmem:[%s877_s2 + $0xd0] sm:$0xff] %v277_v33  ;;  %339 = vst.msk [vmem:[%s877_s2 + $0xd8] sm:$0xff] %vm312_vm0, %v278_v34  ;;  %v65_v33 = vld [vmem:[%s876_s1 + $0x1b0] sm:$0xff]  ;;  %v66_v34 = vld [vmem:[%s876_s1 + $0x1b8] sm:$0xff] }
  0x9d   :  { %336 = vst [vmem:[%s877_s2 + $0xc0] sm:$0xff] %v275_v35  ;;  %337 = vst.msk [vmem:[%s877_s2 + $0xc8] sm:$0xff] %vm312_vm0, %v276_v36  ;;  %v179_v41 = vpop.permute.xlu1 %178  ;;  %v174_v42 = vpop.permute.xlu0 %173  ;;  %v63_v35 = vld [vmem:[%s876_s1 + $0x1a0] sm:$0xff]  ;;  %v64_v36 = vld [vmem:[%s876_s1 + $0x1a8] sm:$0xff] }
  0x9e   :  { %v281_v43 = vmul.f32 %v179_v41, %v41_v37  ;;  %v282_v44 = vmul.f32 %v179_v41, %v42_v38  ;;  %v279_v45 = vmul.f32 %v174_v42, %v39_v39  ;;  %v280_v46 = vmul.f32 %v174_v42, %v40_v40 }
  0xa0   :  { %342 = vst [vmem:[%s877_s2 + $0xf0] sm:$0xff] %v281_v43  ;;  %343 = vst.msk [vmem:[%s877_s2 + $0xf8] sm:$0xff] %vm312_vm0, %v282_v44  ;;  %v69_v43 = vld [vmem:[%s876_s1 + $0x1d0] sm:$0xff]  ;;  %v70_v44 = vld [vmem:[%s876_s1 + $0x1d8] sm:$0xff] }
  0xa1   :  { %340 = vst [vmem:[%s877_s2 + $0xe0] sm:$0xff] %v279_v45  ;;  %341 = vst.msk [vmem:[%s877_s2 + $0xe8] sm:$0xff] %vm312_vm0, %v280_v46  ;;  %v189_v51 = vpop.permute.xlu1 %188  ;;  %v184_v52 = vpop.permute.xlu0 %183  ;;  %v67_v45 = vld [vmem:[%s876_s1 + $0x1c0] sm:$0xff]  ;;  %v68_v46 = vld [vmem:[%s876_s1 + $0x1c8] sm:$0xff] }
  0xa2   :  { %v285_v53 = vmul.f32 %v189_v51, %v45_v47  ;;  %v286_v54 = vmul.f32 %v189_v51, %v46_v48  ;;  %v283_v55 = vmul.f32 %v184_v52, %v43_v49  ;;  %v284_v56 = vmul.f32 %v184_v52, %v44_v50 }
  0xa4   :  { %346 = vst [vmem:[%s877_s2 + $0x110] sm:$0xff] %v285_v53  ;;  %347 = vst.msk [vmem:[%s877_s2 + $0x118] sm:$0xff] %vm312_vm0, %v286_v54 }
  0xa5   :  { %344 = vst [vmem:[%s877_s2 + $0x100] sm:$0xff] %v283_v55  ;;  %345 = vst.msk [vmem:[%s877_s2 + $0x108] sm:$0xff] %vm312_vm0, %v284_v56  ;;  %v199_v61 = vpop.permute.xlu1 %198  ;;  %v194_v62 = vpop.permute.xlu0 %193 }
  0xa6   :  { %v289_v63 = vmul.f32 %v199_v61, %v49_v57  ;;  %v290_v0 = vmul.f32 %v199_v61, %v50_v58  ;;  %v287_v1 = vmul.f32 %v194_v62, %v47_v59  ;;  %v288_v2 = vmul.f32 %v194_v62, %v48_v60 }
  0xa8   :  { %350 = vst [vmem:[%s877_s2 + $0x130] sm:$0xff] %v289_v63  ;;  %351 = vst.msk [vmem:[%s877_s2 + $0x138] sm:$0xff] %vm312_vm0, %v290_v0 }
  0xa9   :  { %348 = vst [vmem:[%s877_s2 + $0x120] sm:$0xff] %v287_v1  ;;  %349 = vst.msk [vmem:[%s877_s2 + $0x128] sm:$0xff] %vm312_vm0, %v288_v2  ;;  %v209_v7 = vpop.permute.xlu1 %208  ;;  %v204_v8 = vpop.permute.xlu0 %203 }
  0xaa   :  { %v293_v9 = vmul.f32 %v209_v7, %v53_v3  ;;  %v294_v10 = vmul.f32 %v209_v7, %v54_v4  ;;  %v291_v11 = vmul.f32 %v204_v8, %v51_v5  ;;  %v292_v12 = vmul.f32 %v204_v8, %v52_v6 }
  0xac   :  { %354 = vst [vmem:[%s877_s2 + $0x150] sm:$0xff] %v293_v9  ;;  %355 = vst.msk [vmem:[%s877_s2 + $0x158] sm:$0xff] %vm312_vm0, %v294_v10 }
  0xad   :  { %352 = vst [vmem:[%s877_s2 + $0x140] sm:$0xff] %v291_v11  ;;  %353 = vst.msk [vmem:[%s877_s2 + $0x148] sm:$0xff] %vm312_vm0, %v292_v12  ;;  %v219_v17 = vpop.permute.xlu1 %218  ;;  %v214_v18 = vpop.permute.xlu0 %213 }
  0xae   :  { %v297_v19 = vmul.f32 %v219_v17, %v57_v13  ;;  %v298_v20 = vmul.f32 %v219_v17, %v58_v14  ;;  %v295_v21 = vmul.f32 %v214_v18, %v55_v15  ;;  %v296_v22 = vmul.f32 %v214_v18, %v56_v16 }
  0xb0   :  { %358 = vst [vmem:[%s877_s2 + $0x170] sm:$0xff] %v297_v19  ;;  %359 = vst.msk [vmem:[%s877_s2 + $0x178] sm:$0xff] %vm312_vm0, %v298_v20 }
  0xb1   :  { %356 = vst [vmem:[%s877_s2 + $0x160] sm:$0xff] %v295_v21  ;;  %357 = vst.msk [vmem:[%s877_s2 + $0x168] sm:$0xff] %vm312_vm0, %v296_v22  ;;  %v229_v27 = vpop.permute.xlu1 %228  ;;  %v224_v28 = vpop.permute.xlu0 %223 }
  0xb2   :  { %v301_v29 = vmul.f32 %v229_v27, %v61_v23  ;;  %v302_v30 = vmul.f32 %v229_v27, %v62_v24  ;;  %v299_v31 = vmul.f32 %v224_v28, %v59_v25  ;;  %v300_v32 = vmul.f32 %v224_v28, %v60_v26 }
  0xb4   :  { %362 = vst [vmem:[%s877_s2 + $0x190] sm:$0xff] %v301_v29  ;;  %363 = vst.msk [vmem:[%s877_s2 + $0x198] sm:$0xff] %vm312_vm0, %v302_v30 }
  0xb5   :  { %360 = vst [vmem:[%s877_s2 + $0x180] sm:$0xff] %v299_v31  ;;  %361 = vst.msk [vmem:[%s877_s2 + $0x188] sm:$0xff] %vm312_vm0, %v300_v32  ;;  %v239_v37 = vpop.permute.xlu1 %238  ;;  %v234_v38 = vpop.permute.xlu0 %233 }
  0xb6   :  { %v305_v39 = vmul.f32 %v239_v37, %v65_v33  ;;  %v306_v40 = vmul.f32 %v239_v37, %v66_v34  ;;  %v303_v41 = vmul.f32 %v234_v38, %v63_v35  ;;  %v304_v42 = vmul.f32 %v234_v38, %v64_v36 }
  0xb8   :  { %366 = vst [vmem:[%s877_s2 + $0x1b0] sm:$0xff] %v305_v39  ;;  %367 = vst.msk [vmem:[%s877_s2 + $0x1b8] sm:$0xff] %vm312_vm0, %v306_v40 }
  0xb9   :  { %364 = vst [vmem:[%s877_s2 + $0x1a0] sm:$0xff] %v303_v41  ;;  %365 = vst.msk [vmem:[%s877_s2 + $0x1a8] sm:$0xff] %vm312_vm0, %v304_v42  ;;  %v249_v47 = vpop.permute.xlu1 %248  ;;  %v244_v48 = vpop.permute.xlu0 %243 }
  0xba   :  { %v309_v49 = vmul.f32 %v249_v47, %v69_v43  ;;  %v310_v50 = vmul.f32 %v249_v47, %v70_v44  ;;  %v307_v51 = vmul.f32 %v244_v48, %v67_v45  ;;  %v308_v52 = vmul.f32 %v244_v48, %v68_v46 }
  0xbc   :  { %370 = vst [vmem:[%s877_s2 + $0x1d0] sm:$0xff] %v309_v49  ;;  %371 = vst.msk [vmem:[%s877_s2 + $0x1d8] sm:$0xff] %vm312_vm0, %v310_v50 }
  0xbd   :  { %368 = vst [vmem:[%s877_s2 + $0x1c0] sm:$0xff] %v307_v51  ;;  %369 = vst.msk [vmem:[%s877_s2 + $0x1c8] sm:$0xff] %vm312_vm0, %v308_v52 }

</bundles_post_ra>
